<compile_context>
chip_gen: v6e
topology: v6e:2x2x1
jax: 0.10.0
libtpu: 0.0.40
codegen_flags: <defaults>
</compile_context>

<pallas_src>
import functools

import numpy as np
import jax
import jax.numpy as jnp
from jax import lax
from jax.experimental import pallas as pl
from jax.experimental.pallas import tpu as pltpu

SELU_SCALE = 1.0507009873554805
SELU_ALPHA = 1.6732632423543772
BN_EPS = 1e-5
_SUBLANE = 8   # f32 sublane tile
_LANE = 128    # lane tile


def _round_up(x, m):
    return (x + m - 1) // m * m


# ---------------------------------------------------------------------------
# Pallas kernel
# ---------------------------------------------------------------------------
def _block_kernel(x_ref, w1_ref, a1_ref, b1_ref, w2_ref, a2_ref, b2_ref, o_ref,
                  *, K, W, Lp, last, a_bit_final):
    # x_ref : (Bt, Cin_p, HW_pad)  channels on sublanes, flat spatial on lanes
    # w1_ref: (C1, K*K*Cin_p)      block-diagonal (groups fused) conv1 weight
    # w2_ref: (Cout, C1)           block-diagonal conv2 (1x1) weight
    # a*/b* : (C, 1)               folded conv-bias + eval-BN affine
    # o_ref : (Bt, Cout, Lp)       "wide" output; valid corners extracted outside
    Bt = x_ref.shape[0]

    # hoisted once per grid step (shared by all Bt images)
    w1 = w1_ref[...]
    w2 = w2_ref[...]
    a1 = a1_ref[...]
    b1 = b1_ref[...]
    a2 = a2_ref[...]
    b2 = b2_ref[...]

    # Batched im2col: per image, the K*K taps are lane windows stacked along
    # sublanes (each piece is a whole sublane tile tall: Cin_p % 8 == 0);
    # images are then concatenated along lanes (tile-aligned: Lp % 128 == 0).
    per_image = []
    for b in range(Bt):
        x = x_ref[b]                                         # (Cin_p, HW_pad)
        cols = [x[:, kh * W + kw: kh * W + kw + Lp]
                for kh in range(K) for kw in range(K)]
        per_image.append(jnp.concatenate(cols, axis=0))      # (K*K*Cin_p, Lp)
    pmat = jnp.concatenate(per_image, axis=1)                # (K*K*Cin_p, Bt*Lp)

    # conv1: every image, every group and every tap in ONE MXU contraction
    h = lax.dot_general(w1, pmat, (((1,), (0,)), ((), ())),
                        preferred_element_type=jnp.float32)  # (C1, Bt*Lp)
    h = h * a1 + b1                                          # bias + bn1
    h = SELU_SCALE * jnp.where(h > 0, h, SELU_ALPHA * (jnp.exp(h) - 1.0))

    # conv2 (grouped 1x1, fused) + bias + bn2 -- one contraction for the batch
    y = lax.dot_general(w2, h, (((1,), (0,)), ((), ())),
                        preferred_element_type=jnp.float32)  # (Cout, Bt*Lp)
    y = y * a2 + b2

    if not last:
        # 2 * Binarize01Act(y) - 1  ->  {+1, -1}
        y = jnp.where(y >= 0, 1.0, -1.0)
    else:
        if a_bit_final == 32:
            q = y
        elif a_bit_final == 1:
            q = jnp.sign(jnp.clip(y, 0.0, 1.0))              # coef == 1
        else:
            n = float(2 ** a_bit_final - 1)
            # coef * round(clamp*n)/n == round(clamp*n)
            q = jnp.round(jnp.clip(y, 0.0, 1.0) * n)
        y = jnp.clip(q, 0.0, 6.0)                            # relu6

    y = y.astype(o_ref.dtype)
    # per-image stores: lane slices at multiples of Lp (Lp % 128 == 0) ->
    # fully unmasked vector stores
    for b in range(Bt):
        o_ref[b] = y[:, b * Lp:(b + 1) * Lp]


# ---------------------------------------------------------------------------
# Wrapper
# ---------------------------------------------------------------------------
def base_block_forward(x_nchw, params, *, kerneltype, stride, last,
                       a_bit_final, batch_tile=None):
    """Forward pass. x_nchw: (N, Cin, H, W) like PyTorch. Returns NCHW f32."""
    w1bd, a1, b1, w2bd, a2, b2 = params
    N, Cin, H, W = x_nchw.shape
    K = kerneltype
    Cout = w2bd.shape[0]
    cin_p = _round_up(Cin, _SUBLANE)
    assert w1bd.shape[1] == K * K * cin_p

    Hout = (H - K) // stride + 1
    Wout = (W - K) // stride + 1
    HW = H * W
    # wide length: covers every needed top-left corner of the conv window
    L = (Hout - 1) * stride * W + (Wout - 1) * stride + 1
    Lp = _round_up(L, _LANE)                        # lane-dense wide length
    # flat-spatial padding so the last tap window (start (K-1)*(W+1)) still
    # has Lp lanes available
    HW_pad = max(HW, (K - 1) * (W + 1) + Lp)

    # NCHW consumed natively: flatten spatial (free) + zero-pad channels to the
    # sublane tile and spatial to HW_pad so all in-kernel concats are aligned.
    x = x_nchw.reshape(N, Cin, HW)
    if cin_p != Cin or HW_pad != HW:
        x = jnp.pad(x, ((0, 0), (0, cin_p - Cin), (0, HW_pad - HW)))

    if batch_tile is None:
        batch_tile = min(N, 8)
    while N % batch_tile:
        batch_tile -= 1

    # output values are exactly representable in bf16 except for the
    # unquantized (last and a_bit_final == 32) path
    out_dtype = jnp.bfloat16 if ((not last) or a_bit_final != 32) else jnp.float32

    kernel = functools.partial(_block_kernel, K=K, W=W, Lp=Lp, last=last,
                               a_bit_final=a_bit_final)
    wide = pl.pallas_call(
        kernel,
        out_shape=jax.ShapeDtypeStruct((N, Cout, Lp), out_dtype),
        grid=(N // batch_tile,),
        in_specs=[
            pl.BlockSpec((batch_tile, cin_p, HW_pad), lambda n: (n, 0, 0)),
            pl.BlockSpec(w1bd.shape, lambda n: (0, 0)),
            pl.BlockSpec(a1.shape, lambda n: (0, 0)),
            pl.BlockSpec(b1.shape, lambda n: (0, 0)),
            pl.BlockSpec(w2bd.shape, lambda n: (0, 0)),
            pl.BlockSpec(a2.shape, lambda n: (0, 0)),
            pl.BlockSpec(b2.shape, lambda n: (0, 0)),
        ],
        out_specs=pl.BlockSpec((batch_tile, Cout, Lp), lambda n: (n, 0, 0)),
        compiler_params=pltpu.CompilerParams(
            dimension_semantics=("parallel",)),
    )(x, w1bd, a1, b1, w2bd, a2, b2)

    # extract the valid conv corners from the wide layout -> NCHW
    idx = (np.arange(Hout)[:, None] * (stride * W)
           + np.arange(Wout)[None, :] * stride).reshape(-1)
    out = jnp.take(wide, jnp.asarray(idx, dtype=jnp.int32), axis=2)
    return out.reshape(N, Cout, Hout, Wout).astype(jnp.float32)


# ---------------------------------------------------------------------------
# Parameter construction (deterministic, mirrors nn.Module __init__ shapes)
# ---------------------------------------------------------------------------
def make_params(key, *, input_channel, t, output_channel, kerneltype, groups):
    c = t * input_channel
    K = kerneltype
    cin_g = input_channel // groups
    c1_g = c // groups
    cout_g = output_channel // groups
    cin_p = _round_up(input_channel, _SUBLANE)
    ks = jax.random.split(key, 12)

    # conv1: (c, input_channel/groups, K, K) + bias(c)
    w1_t = 0.3 * jax.random.normal(ks[0], (c, cin_g, K, K), jnp.float32)
    b1_t = 0.1 * jax.random.normal(ks[1], (c,), jnp.float32)
    # conv2: (output_channel, c/groups, 1, 1) + bias
    w2_t = 0.3 * jax.random.normal(ks[2], (output_channel, c1_g, 1, 1), jnp.float32)
    b2_t = 0.1 * jax.random.normal(ks[3], (output_channel,), jnp.float32)
    # BatchNorm (eval-mode running stats), deterministic but non-trivial
    g1 = 1.0 + 0.1 * jax.random.normal(ks[4], (c,), jnp.float32)
    be1 = 0.1 * jax.random.normal(ks[5], (c,), jnp.float32)
    m1 = 0.1 * jax.random.normal(ks[6], (c,), jnp.float32)
    v1 = jax.random.uniform(ks[7], (c,), jnp.float32, 0.5, 1.5)
    g2 = 1.0 + 0.1 * jax.random.normal(ks[8], (output_channel,), jnp.float32)
    be2 = 0.1 * jax.random.normal(ks[9], (output_channel,), jnp.float32)
    m2 = 0.1 * jax.random.normal(ks[10], (output_channel,), jnp.float32)
    v2 = jax.random.uniform(ks[11], (output_channel,), jnp.float32, 0.5, 1.5)

    # fold conv bias + eval-mode BN into per-channel affine: y*a + b
    s1 = g1 / jnp.sqrt(v1 + BN_EPS)
    a1 = s1
    b1 = (b1_t - m1) * s1 + be1
    s2 = g2 / jnp.sqrt(v2 + BN_EPS)
    a2 = s2
    b2 = (b2_t - m2) * s2 + be2

    # conv1 -> block-diagonal (groups fused) weight of shape (C1, K*K*Cin_p);
    # column index = (kh*K + kw) * Cin_p + global_input_channel
    gi = jnp.arange(groups)
    w1_g = jnp.transpose(w1_t.reshape(groups, c1_g, cin_g, K, K),
                         (0, 1, 3, 4, 2))                    # (G,c1_g,K,K,cin_g)
    w1_full = jnp.zeros((groups, c1_g, K, K, groups, cin_g), jnp.float32)
    w1_full = w1_full.at[gi, :, :, :, gi, :].set(w1_g)       # block diagonal
    w1_bd = w1_full.reshape(c, K, K, input_channel)
    if cin_p != input_channel:
        w1_bd = jnp.pad(w1_bd, ((0, 0), (0, 0), (0, 0),
                                (0, cin_p - input_channel)))
    w1_bd = w1_bd.reshape(c, K * K * cin_p)

    # conv2 (1x1) -> block-diagonal (Cout, C1)
    w2_g = w2_t[:, :, 0, 0].reshape(groups, cout_g, c1_g)
    w2_full = jnp.zeros((groups, cout_g, groups, c1_g), jnp.float32)
    w2_full = w2_full.at[gi, :, gi, :].set(w2_g)
    w2_bd = w2_full.reshape(output_channel, c)

    kernel_params = (w1_bd, a1.reshape(-1, 1), b1.reshape(-1, 1),
                     w2_bd, a2.reshape(-1, 1), b2.reshape(-1, 1))
    torch_params = (w1_t, b1_t, (g1, be1, m1, v1), w2_t, b2_t, (g2, be2, m2, v2))
    return kernel_params, torch_params


# ---------------------------------------------------------------------------
# Pure-JAX reference (mirrors the PyTorch graph) for a correctness check
# ---------------------------------------------------------------------------
def reference_nchw(x, torch_params, *, stride, groups, last, a_bit_final):
    w1_t, b1_t, (g1, be1, m1, v1), w2_t, b2_t, (g2, be2, m2, v2) = torch_params
    dn = ("NCHW", "OIHW", "NCHW")
    y = lax.conv_general_dilated(x, w1_t, (stride, stride), "VALID",
                                 dimension_numbers=dn, feature_group_count=groups)
    y = y + b1_t[None, :, None, None]
    y = (y - m1[None, :, None, None]) / jnp.sqrt(v1 + BN_EPS)[None, :, None, None] \
        * g1[None, :, None, None] + be1[None, :, None, None]
    y = jax.nn.selu(y)
    z = lax.conv_general_dilated(y, w2_t, (1, 1), "VALID",
                                 dimension_numbers=dn, feature_group_count=groups)
    z = z + b2_t[None, :, None, None]
    z = (z - m2[None, :, None, None]) / jnp.sqrt(v2 + BN_EPS)[None, :, None, None] \
        * g2[None, :, None, None] + be2[None, :, None, None]
    if not last:
        z = jnp.where(z >= 0, 1.0, -1.0)
    else:
        if a_bit_final == 32:
            q = z
        elif a_bit_final == 1:
            q = jnp.sign(jnp.clip(z, 0.0, 1.0))
        else:
            n = float(2 ** a_bit_final - 1)
            q = jnp.round(jnp.clip(z, 0.0, 1.0) * n)
        z = jnp.clip(q, 0.0, 6.0)
    return z


if __name__ == "__main__":
    # module config (small, consistent with __init__):
    #   input_channel=4, t=2 -> expansion c=8, output_channel=8,
    #   kerneltype=3, stride=1, channel (== groups) = 2, args.a_bit_final=2
    input_channel, t, output_channel = 4, 2, 8
    kerneltype, stride, groups = 3, 1, 2
    a_bit_final = 2
    N, H, W = 2, 16, 16

    key = jax.random.PRNGKey(0)
    kx, kp = jax.random.split(key)
    x = jax.random.normal(kx, (N, input_channel, H, W), jnp.float32)   # NCHW
    kernel_params, torch_params = make_params(
        kp, input_channel=input_channel, t=t, output_channel=output_channel,
        kerneltype=kerneltype, groups=groups)

    ok = True
    for last in (False, True):
        out = base_block_forward(x, kernel_params, kerneltype=kerneltype,
                                 stride=stride, last=last,
                                 a_bit_final=a_bit_final)
        out = jax.block_until_ready(out)
        ref = reference_nchw(x, torch_params, stride=stride, groups=groups,
                             last=last, a_bit_final=a_bit_final)
        diff = jnp.abs(out - ref)
        # allow a handful of boundary flips from float-rounding at the
        # binarize / round thresholds
        n_bad = int(jnp.sum(diff > 1e-3))
        if n_bad > 5:
            ok = False
            print(f"mismatch (last={last}): {n_bad} elements, "
                  f"max diff {float(diff.max())}")

    if ok:
        print("KERNEL_OK")
</pallas_src>

<mosaic_0001>
module attributes {stable_mosaic.version = 11 : i64} {
  func.func @_block_kernel(%arg0: i32, %arg1: memref<2x8x290xf32, #tpu.memory_space<vmem>>, %arg2: memref<8x72xf32, #tpu.memory_space<vmem>>, %arg3: memref<8x1xf32, #tpu.memory_space<vmem>>, %arg4: memref<8x1xf32, #tpu.memory_space<vmem>>, %arg5: memref<8x8xf32, #tpu.memory_space<vmem>>, %arg6: memref<8x1xf32, #tpu.memory_space<vmem>>, %arg7: memref<8x1xf32, #tpu.memory_space<vmem>>, %arg8: memref<2x8x256xbf16, #tpu.memory_space<vmem>>) attributes {dimension_semantics = [#tpu.dimension_semantics<parallel>], iteration_bounds = array<i64: 1>, scalar_prefetch = 0 : i64, scratch_operands = 0 : i64, tpu.core_type = #tpu.core_type<tc>, window_params = [{transform_indices = @transform_0, window_bounds = array<i64: 2, 8, 290>}, {pipeline_mode = #tpu.pipeline_mode<synchronous>, transform_indices = @transform_1, window_bounds = array<i64: 8, 72>}, {pipeline_mode = #tpu.pipeline_mode<synchronous>, transform_indices = @transform_2, window_bounds = array<i64: 8, 1>}, {pipeline_mode = #tpu.pipeline_mode<synchronous>, transform_indices = @transform_3, window_bounds = array<i64: 8, 1>}, {pipeline_mode = #tpu.pipeline_mode<synchronous>, transform_indices = @transform_4, window_bounds = array<i64: 8, 8>}, {pipeline_mode = #tpu.pipeline_mode<synchronous>, transform_indices = @transform_5, window_bounds = array<i64: 8, 1>}, {pipeline_mode = #tpu.pipeline_mode<synchronous>, transform_indices = @transform_6, window_bounds = array<i64: 8, 1>}, {transform_indices = @transform_7, window_bounds = array<i64: 2, 8, 256>}]} {
    %c0 = arith.constant 0 : index
    %c0_0 = arith.constant 0 : index
    %0 = vector.load %arg2[%c0, %c0_0] : memref<8x72xf32, #tpu.memory_space<vmem>>, vector<8x72xf32>
    %c0_1 = arith.constant 0 : index
    %c0_2 = arith.constant 0 : index
    %1 = vector.load %arg5[%c0_1, %c0_2] : memref<8x8xf32, #tpu.memory_space<vmem>>, vector<8x8xf32>
    %c0_3 = arith.constant 0 : index
    %c0_4 = arith.constant 0 : index
    %2 = vector.load %arg3[%c0_3, %c0_4] : memref<8x1xf32, #tpu.memory_space<vmem>>, vector<8x1xf32>
    %c0_5 = arith.constant 0 : index
    %c0_6 = arith.constant 0 : index
    %3 = vector.load %arg4[%c0_5, %c0_6] : memref<8x1xf32, #tpu.memory_space<vmem>>, vector<8x1xf32>
    %c0_7 = arith.constant 0 : index
    %c0_8 = arith.constant 0 : index
    %4 = vector.load %arg6[%c0_7, %c0_8] : memref<8x1xf32, #tpu.memory_space<vmem>>, vector<8x1xf32>
    %c0_9 = arith.constant 0 : index
    %c0_10 = arith.constant 0 : index
    %5 = vector.load %arg7[%c0_9, %c0_10] : memref<8x1xf32, #tpu.memory_space<vmem>>, vector<8x1xf32>
    %c0_11 = arith.constant 0 : index
    %c0_12 = arith.constant 0 : index
    %c0_13 = arith.constant 0 : index
    %6 = vector.load %arg1[%c0_11, %c0_12, %c0_13] : memref<2x8x290xf32, #tpu.memory_space<vmem>>, vector<1x8x290xf32>
    %7 = vector.shape_cast %6 : vector<1x8x290xf32> to vector<8x290xf32>
    %8 = vector.extract_strided_slice %7 {offsets = [0, 0], sizes = [8, 256], strides = [1, 1]} : vector<8x290xf32> to vector<8x256xf32>
    %9 = vector.extract_strided_slice %7 {offsets = [0, 1], sizes = [8, 256], strides = [1, 1]} : vector<8x290xf32> to vector<8x256xf32>
    %10 = vector.extract_strided_slice %7 {offsets = [0, 2], sizes = [8, 256], strides = [1, 1]} : vector<8x290xf32> to vector<8x256xf32>
    %11 = vector.extract_strided_slice %7 {offsets = [0, 16], sizes = [8, 256], strides = [1, 1]} : vector<8x290xf32> to vector<8x256xf32>
    %12 = vector.extract_strided_slice %7 {offsets = [0, 17], sizes = [8, 256], strides = [1, 1]} : vector<8x290xf32> to vector<8x256xf32>
    %13 = vector.extract_strided_slice %7 {offsets = [0, 18], sizes = [8, 256], strides = [1, 1]} : vector<8x290xf32> to vector<8x256xf32>
    %14 = vector.extract_strided_slice %7 {offsets = [0, 32], sizes = [8, 256], strides = [1, 1]} : vector<8x290xf32> to vector<8x256xf32>
    %15 = vector.extract_strided_slice %7 {offsets = [0, 33], sizes = [8, 256], strides = [1, 1]} : vector<8x290xf32> to vector<8x256xf32>
    %16 = vector.extract_strided_slice %7 {offsets = [0, 34], sizes = [8, 256], strides = [1, 1]} : vector<8x290xf32> to vector<8x256xf32>
    %17 = tpu.concatenate %8, %9, %10, %11, %12, %13, %14, %15, %16 in 0 : vector<8x256xf32>, vector<8x256xf32>, vector<8x256xf32>, vector<8x256xf32>, vector<8x256xf32>, vector<8x256xf32>, vector<8x256xf32>, vector<8x256xf32>, vector<8x256xf32> -> vector<72x256xf32>
    %c1 = arith.constant 1 : index
    %c0_14 = arith.constant 0 : index
    %c0_15 = arith.constant 0 : index
    %18 = vector.load %arg1[%c1, %c0_14, %c0_15] : memref<2x8x290xf32, #tpu.memory_space<vmem>>, vector<1x8x290xf32>
    %19 = vector.shape_cast %18 : vector<1x8x290xf32> to vector<8x290xf32>
    %20 = vector.extract_strided_slice %19 {offsets = [0, 0], sizes = [8, 256], strides = [1, 1]} : vector<8x290xf32> to vector<8x256xf32>
    %21 = vector.extract_strided_slice %19 {offsets = [0, 1], sizes = [8, 256], strides = [1, 1]} : vector<8x290xf32> to vector<8x256xf32>
    %22 = vector.extract_strided_slice %19 {offsets = [0, 2], sizes = [8, 256], strides = [1, 1]} : vector<8x290xf32> to vector<8x256xf32>
    %23 = vector.extract_strided_slice %19 {offsets = [0, 16], sizes = [8, 256], strides = [1, 1]} : vector<8x290xf32> to vector<8x256xf32>
    %24 = vector.extract_strided_slice %19 {offsets = [0, 17], sizes = [8, 256], strides = [1, 1]} : vector<8x290xf32> to vector<8x256xf32>
    %25 = vector.extract_strided_slice %19 {offsets = [0, 18], sizes = [8, 256], strides = [1, 1]} : vector<8x290xf32> to vector<8x256xf32>
    %26 = vector.extract_strided_slice %19 {offsets = [0, 32], sizes = [8, 256], strides = [1, 1]} : vector<8x290xf32> to vector<8x256xf32>
    %27 = vector.extract_strided_slice %19 {offsets = [0, 33], sizes = [8, 256], strides = [1, 1]} : vector<8x290xf32> to vector<8x256xf32>
    %28 = vector.extract_strided_slice %19 {offsets = [0, 34], sizes = [8, 256], strides = [1, 1]} : vector<8x290xf32> to vector<8x256xf32>
    %29 = tpu.concatenate %20, %21, %22, %23, %24, %25, %26, %27, %28 in 0 : vector<8x256xf32>, vector<8x256xf32>, vector<8x256xf32>, vector<8x256xf32>, vector<8x256xf32>, vector<8x256xf32>, vector<8x256xf32>, vector<8x256xf32>, vector<8x256xf32> -> vector<72x256xf32>
    %30 = tpu.concatenate %17, %29 in 1 : vector<72x256xf32>, vector<72x256xf32> -> vector<72x512xf32>
    %cst = arith.constant dense<0.000000e+00> : vector<8x512xf32>
    %31 = tpu.matmul %0, %30, %cst {dimension_numbers = #tpu.dot_dimension_numbers<[1], [0], [0], [1], [0, 0, 1, 1], [], []>} : vector<8x72xf32>, vector<72x512xf32>, vector<8x512xf32> -> vector<8x512xf32>
    %32 = vector.broadcast %2 : vector<8x1xf32> to vector<8x512xf32>
    %33 = arith.mulf %31, %32 : vector<8x512xf32>
    %34 = vector.broadcast %3 : vector<8x1xf32> to vector<8x512xf32>
    %35 = arith.addf %33, %34 : vector<8x512xf32>
    %cst_16 = arith.constant 0.000000e+00 : f32
    %36 = vector.broadcast %cst_16 : f32 to vector<8x512xf32>
    %37 = arith.cmpf ogt, %35, %36 : vector<8x512xf32>
    %38 = math.exp %35 : vector<8x512xf32>
    %cst_17 = arith.constant 1.000000e+00 : f32
    %39 = vector.broadcast %cst_17 : f32 to vector<8x512xf32>
    %40 = arith.subf %38, %39 : vector<8x512xf32>
    %cst_18 = arith.constant 1.67326319 : f32
    %41 = vector.broadcast %cst_18 : f32 to vector<8x512xf32>
    %42 = arith.mulf %41, %40 : vector<8x512xf32>
    %43 = arith.select %37, %35, %42 : vector<8x512xi1>, vector<8x512xf32>
    %cst_19 = arith.constant 1.05070102 : f32
    %44 = vector.broadcast %cst_19 : f32 to vector<8x512xf32>
    %45 = arith.mulf %44, %43 : vector<8x512xf32>
    %cst_20 = arith.constant dense<0.000000e+00> : vector<8x512xf32>
    %46 = tpu.matmul %1, %45, %cst_20 {dimension_numbers = #tpu.dot_dimension_numbers<[1], [0], [0], [1], [0, 0, 1, 1], [], []>} : vector<8x8xf32>, vector<8x512xf32>, vector<8x512xf32> -> vector<8x512xf32>
    %47 = vector.broadcast %4 : vector<8x1xf32> to vector<8x512xf32>
    %48 = arith.mulf %46, %47 : vector<8x512xf32>
    %49 = vector.broadcast %5 : vector<8x1xf32> to vector<8x512xf32>
    %50 = arith.addf %48, %49 : vector<8x512xf32>
    %cst_21 = arith.constant 0.000000e+00 : f32
    %51 = vector.broadcast %cst_21 : f32 to vector<8x512xf32>
    %52 = arith.cmpf oge, %50, %51 : vector<8x512xf32>
    %cst_22 = arith.constant 1.000000e+00 : f32
    %cst_23 = arith.constant -1.000000e+00 : f32
    %53 = vector.broadcast %cst_22 : f32 to vector<8x512xf32>
    %54 = vector.broadcast %cst_23 : f32 to vector<8x512xf32>
    %55 = arith.select %52, %53, %54 : vector<8x512xi1>, vector<8x512xf32>
    %56 = arith.truncf %55 : vector<8x512xf32> to vector<8x512xbf16>
    %57 = vector.extract_strided_slice %56 {offsets = [0, 0], sizes = [8, 256], strides = [1, 1]} : vector<8x512xbf16> to vector<8x256xbf16>
    %c0_24 = arith.constant 0 : index
    %c0_25 = arith.constant 0 : index
    %c0_26 = arith.constant 0 : index
    %58 = vector.load %arg8[%c0_24, %c0_25, %c0_26] : memref<2x8x256xbf16, #tpu.memory_space<vmem>>, vector<1x8x256xbf16>
    %59 = vector.shape_cast %58 : vector<1x8x256xbf16> to vector<8x256xbf16>
    %60 = vector.shape_cast %57 : vector<8x256xbf16> to vector<1x8x256xbf16>
    tpu.vector_store %arg8[%c0_24, %c0_25, %c0_26], %60 {strides = array<i32>} : memref<2x8x256xbf16, #tpu.memory_space<vmem>>, vector<1x8x256xbf16>,
    %61 = vector.extract_strided_slice %56 {offsets = [0, 256], sizes = [8, 256], strides = [1, 1]} : vector<8x512xbf16> to vector<8x256xbf16>
    %c1_27 = arith.constant 1 : index
    %c0_28 = arith.constant 0 : index
    %c0_29 = arith.constant 0 : index
    %62 = vector.load %arg8[%c1_27, %c0_28, %c0_29] : memref<2x8x256xbf16, #tpu.memory_space<vmem>>, vector<1x8x256xbf16>
    %63 = vector.shape_cast %62 : vector<1x8x256xbf16> to vector<8x256xbf16>
    %64 = vector.shape_cast %61 : vector<8x256xbf16> to vector<1x8x256xbf16>
    tpu.vector_store %arg8[%c1_27, %c0_28, %c0_29], %64 {strides = array<i32>} : memref<2x8x256xbf16, #tpu.memory_space<vmem>>, vector<1x8x256xbf16>,
    return
  }
  func.func @transform_0(%arg0: i32) -> (i32, i32, i32) {
    %c0_i32 = arith.constant 0 : i32
    %c0_i32_0 = arith.constant 0 : i32
    %c0_i32_1 = arith.constant 0 : i32
    return %arg0, %c0_i32, %c0_i32_0 : i32, i32, i32
  }
  func.func @transform_1(%arg0: i32) -> (i32, i32) {
    %c0_i32 = arith.constant 0 : i32
    %c0_i32_0 = arith.constant 0 : i32
    %c0_i32_1 = arith.constant 0 : i32
    return %c0_i32, %c0_i32_0 : i32, i32
  }
  func.func @transform_2(%arg0: i32) -> (i32, i32) {
    %c0_i32 = arith.constant 0 : i32
    %c0_i32_0 = arith.constant 0 : i32
    %c0_i32_1 = arith.constant 0 : i32
    return %c0_i32, %c0_i32_0 : i32, i32
  }
  func.func @transform_3(%arg0: i32) -> (i32, i32) {
    %c0_i32 = arith.constant 0 : i32
    %c0_i32_0 = arith.constant 0 : i32
    %c0_i32_1 = arith.constant 0 : i32
    return %c0_i32, %c0_i32_0 : i32, i32
  }
  func.func @transform_4(%arg0: i32) -> (i32, i32) {
    %c0_i32 = arith.constant 0 : i32
    %c0_i32_0 = arith.constant 0 : i32
    %c0_i32_1 = arith.constant 0 : i32
    return %c0_i32, %c0_i32_0 : i32, i32
  }
  func.func @transform_5(%arg0: i32) -> (i32, i32) {
    %c0_i32 = arith.constant 0 : i32
    %c0_i32_0 = arith.constant 0 : i32
    %c0_i32_1 = arith.constant 0 : i32
    return %c0_i32, %c0_i32_0 : i32, i32
  }
  func.func @transform_6(%arg0: i32) -> (i32, i32) {
    %c0_i32 = arith.constant 0 : i32
    %c0_i32_0 = arith.constant 0 : i32
    %c0_i32_1 = arith.constant 0 : i32
    return %c0_i32, %c0_i32_0 : i32, i32
  }
  func.func @transform_7(%arg0: i32) -> (i32, i32, i32) {
    %c0_i32 = arith.constant 0 : i32
    %c0_i32_0 = arith.constant 0 : i32
    %c0_i32_1 = arith.constant 0 : i32
    return %arg0, %c0_i32, %c0_i32_0 : i32, i32, i32
  }
}

</mosaic_0001>

<bundles_post_ra>
// kernel: tpu_custom_call.1
= control target key start
LH: loop header
LB: loop body
LE: loop exit
PB: predicated region body
PF: predicated region fallthrough
CT: control target
= control target key end

     0   :  { %12 = vsyncpa [#allocation3], 0  ;;  %s840_s0 = inlined_call_operand.hbm [shape: f32[2,8,290], index: 0, kind: input, shape index: {}]   ;;  %s841_s1 = inlined_call_operand.vmem [shape: f32[8,72], index: 1, kind: input, shape index: {}]   ;;  %s842_s2 = inlined_call_operand.vmem [shape: f32[8,1], index: 2, kind: input, shape index: {}]   ;;  %s843_s3 = inlined_call_operand.vmem [shape: f32[8,1], index: 3, kind: input, shape index: {}]   ;;  %s844_s4 = inlined_call_operand.vmem [shape: f32[8,8], index: 4, kind: input, shape index: {}]   ;;  %s845_s5 = inlined_call_operand.vmem [shape: f32[8,1], index: 5, kind: input, shape index: {}]   ;;  %s846_s6 = inlined_call_operand.vmem [shape: f32[8,1], index: 6, kind: input, shape index: {}]   ;;  %s847_s7 = inlined_call_operand.hbm [shape: bf16[2,8,256], index: 7, kind: output, shape index: {}]  }
   0x1   :  { %13 = vsyncpa [#allocation4], 0  ;;  %s711_s24 = smov [#allocation2]  }
   0x2   :  { %s19_s25 = sshll.u32 %s711_s24, 4  ;;  %s20_s25 = int_to_ptr.vmem [resolvable:$true] %s19_s25 }
   0x3   :  { %s675_s26 = scalar_lea.vmem %s20_s25, 768  ;;  %p680_p1 = scmp.lt.s32.totalorder %s20_s25, %s20_s25 }
   0x4   :  { %p676_p0 = scmp.ne.s32.totalorder %s20_s25, %s675_s26  ;;  %p681_p2 = scmp.lt.s32.totalorder %s675_s26, %s675_s26 }
   0x6   :  { %p682_p3 = por %p681_p2, %p680_p1 }
   0x8   :  { %p683_p4 = pnand %p682_p3, %p676_p0 }
   0xa   :  { %686 = shalt.err (!%p683_p4)
}
   0xb   :  { %s712_s27 = smov 384   ;;  %s713_s28 = smov 24  }
   0xc   :  { %25 = dma.hbm_to_vmem [thread:$0]  %s840_s0, 768, %s20_s25, [#allocation3], %s712_s27, %s712_s27, %s713_s28  }
   0xd   :  { %707 = dma.done.wait [#allocation3], 768  }
   0xe   :  { %708 = vsyncadd [#allocation3], 4294966528  ;;  %v771_v0 = vld [vmem:[#allocation2 + $0x20] sm:$0xff]  ;;  %v773_v1 = vld [vmem:[#allocation2 + $0x8] sm:$0xff]  ;;  %s714_s8 = smov 94   ;;  %s715_s0 = smov 95  }
   0xf   :  { %220 = vrot.lane.b32.xlu1 %v771_v0, %s714_s8  ;;  %132 = vrot.lane.b32.xlu0 %v773_v1, %s714_s8  ;;  %v144_v2 = vld [vmem:[#allocation2 + $0x28] sm:$0xff]  ;;  %v49_v3 = vld [vmem:[#allocation2 + $0x10] sm:$0xff]  ;;  %v777_v4 = vld [vmem:[#allocation2 + $0x18] sm:$0xff]  ;;  %s716_s9 = smov 96   ;;  %s717_s10 = smov 110   ;;  %v721_v6 = vmov 0.0  }
  0x10   :  { %v779_v5 = vld [vmem:[#allocation2] sm:$0xff]  ;;  %s718_s11 = smov 111   ;;  %s719_s12 = smov 112   ;;  %296 = vmatprep.mubr.f32.mxu0 %v721_v6  ;;  %367 = vmatprep.mubr.f32.mxu1 %v721_v6  ;;  %v723_v7 = vmov 0   ;;  %vm136_vm0 = vcmask 769024   ;;  %vm125_vm1 = vcmask 777216  }
  0x11   :  { %s720_s13 = smov 126   ;;  %s722_s14 = smov 127   ;;  %657 = vset.pattern.permute.xlu0 %v723_v7  ;;  %658 = vset.pattern.permute.xlu1 %v723_v7  ;;  %v43_v8 = vld [vmem:[%s842_s2] sm:$0xff]  ;;  %vm114_vm2 = vcmask 785408   ;;  %vm103_vm3 = vcmask 900096   ;;  %vm92_vm4 = vcmask 908288  }
  0x12   :  { %v44_v9 = vld [vmem:[%s843_s3] sm:$0xff]  ;;  %vm81_vm5 = vcmask 916480   ;;  %vm70_vm6 = vcmask 1031168   ;;  %vm59_vm7 = vcmask 1039360   ;;  %vm228_vm8 = vcmask 588800  }
  0x13   :  { %222 = vrot.lane.b32.xlu1 %v144_v2, %s714_s8  ;;  %134 = vrot.lane.b32.xlu0 %v49_v3, %s714_s8  ;;  %v46_v10 = vld [vmem:[%s846_s6] sm:$0xff]  ;;  %vm420_vm13 = vcmask 64512  }
  0x14   :  { %v45_v11 = vld [vmem:[%s845_s5] sm:$0xff] }
  0x17   :  { %218 = vrot.lane.b32.xlu1 %v777_v4, %s714_s8  ;;  %130 = vrot.lane.b32.xlu0 %v779_v5, %s714_s8 }
  0x1b   :  { %123 = vrot.lane.b32.xlu1 %v49_v3, %s715_s0  ;;  %121 = vrot.lane.b32.xlu0 %v773_v1, %s715_s0 }
  0x1f   :  { %212 = vrot.lane.b32.xlu1 %v144_v2, %s715_s0  ;;  %210 = vrot.lane.b32.xlu0 %v771_v0, %s715_s0 }
  0x23   :  { %208 = vrot.lane.b32.xlu1 %v777_v4, %s715_s0  ;;  %119 = vrot.lane.b32.xlu0 %v779_v5, %s715_s0 }
  0x27   :  { %112 = vrot.lane.b32.xlu1 %v49_v3, %s716_s9  ;;  %110 = vrot.lane.b32.xlu0 %v773_v1, %s716_s9 }
  0x2b   :  { %202 = vrot.lane.b32.xlu1 %v144_v2, %s716_s9  ;;  %200 = vrot.lane.b32.xlu0 %v771_v0, %s716_s9 }
  0x2f   :  { %198 = vrot.lane.b32.xlu1 %v777_v4, %s716_s9  ;;  %108 = vrot.lane.b32.xlu0 %v779_v5, %s716_s9 }
  0x33   :  { %101 = vrot.lane.b32.xlu1 %v49_v3, %s717_s10  ;;  %99 = vrot.lane.b32.xlu0 %v773_v1, %s717_s10 }
  0x37   :  { %192 = vrot.lane.b32.xlu1 %v144_v2, %s717_s10  ;;  %190 = vrot.lane.b32.xlu0 %v771_v0, %s717_s10 }
  0x3b   :  { %188 = vrot.lane.b32.xlu1 %v777_v4, %s717_s10  ;;  %97 = vrot.lane.b32.xlu0 %v779_v5, %s717_s10 }
  0x3f   :  { %90 = vrot.lane.b32.xlu1 %v49_v3, %s718_s11  ;;  %88 = vrot.lane.b32.xlu0 %v773_v1, %s718_s11 }
  0x43   :  { %182 = vrot.lane.b32.xlu1 %v144_v2, %s718_s11  ;;  %180 = vrot.lane.b32.xlu0 %v771_v0, %s718_s11 }
  0x47   :  { %178 = vrot.lane.b32.xlu1 %v777_v4, %s718_s11  ;;  %86 = vrot.lane.b32.xlu0 %v779_v5, %s718_s11 }
  0x4b   :  { %79 = vrot.lane.b32.xlu1 %v49_v3, %s719_s12  ;;  %77 = vrot.lane.b32.xlu0 %v773_v1, %s719_s12 }
  0x4f   :  { %172 = vrot.lane.b32.xlu1 %v144_v2, %s719_s12  ;;  %170 = vrot.lane.b32.xlu0 %v771_v0, %s719_s12 }
  0x53   :  { %168 = vrot.lane.b32.xlu1 %v777_v4, %s719_s12  ;;  %75 = vrot.lane.b32.xlu0 %v779_v5, %s719_s12 }
  0x57   :  { %68 = vrot.lane.b32.xlu1 %v49_v3, %s720_s13  ;;  %66 = vrot.lane.b32.xlu0 %v773_v1, %s720_s13 }
  0x5b   :  { %162 = vrot.lane.b32.xlu1 %v144_v2, %s720_s13  ;;  %160 = vrot.lane.b32.xlu0 %v771_v0, %s720_s13 }
  0x5f   :  { %158 = vrot.lane.b32.xlu1 %v777_v4, %s720_s13  ;;  %64 = vrot.lane.b32.xlu0 %v779_v5, %s720_s13 }
  0x63   :  { %57 = vrot.lane.b32.xlu1 %v49_v3, %s722_s14  ;;  %55 = vrot.lane.b32.xlu0 %v773_v1, %s722_s14 }
  0x67   :  { %152 = vrot.lane.b32.xlu1 %v144_v2, %s722_s14  ;;  %150 = vrot.lane.b32.xlu0 %v771_v0, %s722_s14 }
  0x6b   :  { %148 = vrot.lane.b32.xlu1 %v777_v4, %s722_s14  ;;  %53 = vrot.lane.b32.xlu0 %v779_v5, %s722_s14 }
  0x6f   :  { %376 = vperm.xlu0 %657, %v43_v8   ;;  %385 = vperm.xlu1 %658, %v44_v9  }
  0x73   :  { %577 = vperm.xlu0 %657, %v46_v10   ;;  %568 = vperm.xlu1 %658, %v45_v11  }
  0x81   :  { %v221_v12 = vpop.permute.xlu1 %220  ;;  %v133_v13 = vpop.permute.xlu0 %132 }
  0x85   :  { %v223_v14 = vpop.permute.xlu1 %222  ;;  %v135_v15 = vpop.permute.xlu0 %134 }
  0x86   :  { %v138_v16 = vsel %vm136_vm0, %v133_v13, %v135_v15  ;;  %v225_v17 = vsel %vm136_vm0, %v221_v12, %v223_v14 }
  0x87   :  { %246 = vmatprep.subr.mxu0 %v138_v16  ;;  %317 = vmatprep.subr.mxu1 %v225_v17 }
  0x89   :  { %v219_v18 = vpop.permute.xlu1 %218  ;;  %v131_v19 = vpop.permute.xlu0 %130 }
  0x8a   :  { %v137_v20 = vsel %vm136_vm0, %v131_v19, %v133_v13  ;;  %v224_v21 = vsel %vm136_vm0, %v219_v18, %v221_v12 }
  0x8b   :  { %247 = vmatpush1.msra.mxu0 %v137_v20  ;;  %318 = vmatpush1.msra.mxu1 %v224_v21 }
  0x8d   :  { %v124_v22 = vpop.permute.xlu1 %123  ;;  %v122_v23 = vpop.permute.xlu0 %121 }
  0x8e   :  { %v127_v24 = vsel %vm125_vm1, %v122_v23, %v124_v22 }
  0x8f   :  { %248 = vmatprep.subr.mxu0 %v127_v24 }
  0x91   :  { %v213_v25 = vpop.permute.xlu1 %212  ;;  %v211_v26 = vpop.permute.xlu0 %210 }
  0x92   :  { %v215_v27 = vsel %vm125_vm1, %v211_v26, %v213_v25 }
  0x93   :  { %319 = vmatprep.subr.mxu1 %v215_v27 }
  0x95   :  { %v209_v28 = vpop.permute.xlu1 %208  ;;  %v120_v29 = vpop.permute.xlu0 %119 }
  0x96   :  { %v126_v30 = vsel %vm125_vm1, %v120_v29, %v122_v23  ;;  %v214_v31 = vsel %vm125_vm1, %v209_v28, %v211_v26 }
  0x97   :  { %249 = vmatpush1.msra.mxu0 %v126_v30  ;;  %320 = vmatpush1.msra.mxu1 %v214_v31 }
  0x99   :  { %v113_v32 = vpop.permute.xlu1 %112  ;;  %v111_v33 = vpop.permute.xlu0 %110 }
  0x9a   :  { %v116_v34 = vsel %vm114_vm2, %v111_v33, %v113_v32 }
  0x9b   :  { %250 = vmatprep.subr.mxu0 %v116_v34 }
  0x9d   :  { %v203_v35 = vpop.permute.xlu1 %202  ;;  %v201_v36 = vpop.permute.xlu0 %200 }
  0x9e   :  { %v205_v37 = vsel %vm114_vm2, %v201_v36, %v203_v35 }
  0x9f   :  { %321 = vmatprep.subr.mxu1 %v205_v37 }
  0xa1   :  { %v199_v38 = vpop.permute.xlu1 %198  ;;  %v109_v39 = vpop.permute.xlu0 %108 }
  0xa2   :  { %v115_v40 = vsel %vm114_vm2, %v109_v39, %v111_v33  ;;  %v204_v41 = vsel %vm114_vm2, %v199_v38, %v201_v36  ;;  %v41_v33 = vld [vmem:[%s841_s1] sm:$0xff] }
  0xa3   :  { %251 = vmatpush1.msra.mxu0 %v115_v40  ;;  %322 = vmatpush1.msra.mxu1 %v204_v41 }
  0xa5   :  { %v102_v42 = vpop.permute.xlu1 %101  ;;  %v100_v43 = vpop.permute.xlu0 %99 }
  0xa6   :  { %v105_v44 = vsel %vm103_vm3, %v100_v43, %v102_v42 }
  0xa7   :  { %252 = vmatprep.subr.mxu0 %v105_v44 }
  0xa9   :  { %v193_v45 = vpop.permute.xlu1 %192  ;;  %v191_v46 = vpop.permute.xlu0 %190 }
  0xaa   :  { %v195_v47 = vsel %vm103_vm3, %v191_v46, %v193_v45 }
  0xab   :  { %323 = vmatprep.subr.mxu1 %v195_v47 }
  0xad   :  { %v189_v48 = vpop.permute.xlu1 %188  ;;  %v98_v49 = vpop.permute.xlu0 %97 }
  0xae   :  { %v104_v50 = vsel %vm103_vm3, %v98_v49, %v100_v43  ;;  %v194_v51 = vsel %vm103_vm3, %v189_v48, %v191_v46 }
  0xaf   :  { %253 = vmatpush1.msra.mxu0 %v104_v50  ;;  %324 = vmatpush1.msra.mxu1 %v194_v51 }
  0xb1   :  { %v91_v52 = vpop.permute.xlu1 %90  ;;  %v89_v53 = vpop.permute.xlu0 %88 }
  0xb2   :  { %v94_v54 = vsel %vm92_vm4, %v89_v53, %v91_v52 }
  0xb3   :  { %254 = vmatprep.subr.mxu0 %v94_v54 }
  0xb5   :  { %v183_v55 = vpop.permute.xlu1 %182  ;;  %v181_v56 = vpop.permute.xlu0 %180 }
  0xb6   :  { %v185_v57 = vsel %vm92_vm4, %v181_v56, %v183_v55 }
  0xb7   :  { %325 = vmatprep.subr.mxu1 %v185_v57 }
  0xb9   :  { %v179_v58 = vpop.permute.xlu1 %178  ;;  %v87_v59 = vpop.permute.xlu0 %86 }
  0xba   :  { %v93_v60 = vsel %vm92_vm4, %v87_v59, %v89_v53  ;;  %v184_v61 = vsel %vm92_vm4, %v179_v58, %v181_v56 }
  0xbb   :  { %255 = vmatpush1.msra.mxu0 %v93_v60  ;;  %326 = vmatpush1.msra.mxu1 %v184_v61 }
  0xbd   :  { %v80_v62 = vpop.permute.xlu1 %79  ;;  %v78_v63 = vpop.permute.xlu0 %77 }
  0xbe   :  { %v83_v2 = vsel %vm81_vm5, %v78_v63, %v80_v62 }
  0xbf   :  { %256 = vmatprep.subr.mxu0 %v83_v2 }
  0xc1   :  { %v173_v3 = vpop.permute.xlu1 %172  ;;  %v171_v7 = vpop.permute.xlu0 %170 }
  0xc2   :  { %v175_v8 = vsel %vm81_vm5, %v171_v7, %v173_v3 }
  0xc3   :  { %327 = vmatprep.subr.mxu1 %v175_v8 }
  0xc5   :  { %v169_v9 = vpop.permute.xlu1 %168  ;;  %v76_v10 = vpop.permute.xlu0 %75 }
  0xc6   :  { %v82_v11 = vsel %vm81_vm5, %v76_v10, %v78_v63  ;;  %v174_v12 = vsel %vm81_vm5, %v169_v9, %v171_v7  ;;  %v42_v7 = vld [vmem:[%s844_s4] sm:$0xff]  ;;  %s724_s4 = smov [#allocation5]  }
  0xc7   :  { %257 = vmatpush1.msra.mxu0 %v82_v11  ;;  %328 = vmatpush1.msra.mxu1 %v174_v12  ;;  %s616_s6 = sshll.u32 %s724_s4, 4  ;;  %s617_s6 = int_to_ptr.vmem [resolvable:$true] %s616_s6 }
  0xc8   :  { %s687_s23 = scalar_lea.vmem %s617_s6, 256  ;;  %p692_p6 = scmp.lt.s32.totalorder %s617_s6, %s617_s6 }
  0xc9   :  { %v69_v13 = vpop.permute.xlu1 %68  ;;  %v67_v14 = vpop.permute.xlu0 %66  ;;  %p688_p5 = scmp.ne.s32.totalorder %s617_s6, %s687_s23  ;;  %p693_p7 = scmp.lt.s32.totalorder %s687_s23, %s687_s23 }
  0xca   :  { %v72_v15 = vsel %vm70_vm6, %v67_v14, %v69_v13 }
  0xcb   :  { %258 = vmatprep.subr.mxu0 %v72_v15  ;;  %p694_p8 = por %p693_p7, %p692_p6 }
  0xcd   :  { %v163_v16 = vpop.permute.xlu1 %162  ;;  %v161_v17 = vpop.permute.xlu0 %160  ;;  %p695_p9 = pnand %p694_p8, %p688_p5 }
  0xce   :  { %v165_v18 = vsel %vm70_vm6, %v161_v17, %v163_v16 }
  0xcf   :  { %329 = vmatprep.subr.mxu1 %v165_v18 }
  0xd1   :  { %v159_v19 = vpop.permute.xlu1 %158  ;;  %v65_v20 = vpop.permute.xlu0 %64 }
  0xd2   :  { %v71_v21 = vsel %vm70_vm6, %v65_v20, %v67_v14  ;;  %v164_v22 = vsel %vm70_vm6, %v159_v19, %v161_v17 }
  0xd3   :  { %259 = vmatpush1.msra.mxu0 %v71_v21  ;;  %330 = vmatpush1.msra.mxu1 %v164_v22 }
  0xd5   :  { %v58_v23 = vpop.permute.xlu1 %57  ;;  %v56_v24 = vpop.permute.xlu0 %55 }
  0xd6   :  { %v61_v25 = vsel %vm59_vm7, %v56_v24, %v58_v23  ;;  %v725_v23 = vmov -1.0  }
  0xd7   :  { %260 = vmatprep.subr.mxu0 %v61_v25 }
  0xd9   :  { %v153_v26 = vpop.permute.xlu1 %152  ;;  %v151_v27 = vpop.permute.xlu0 %150 }
  0xda   :  { %v155_v28 = vsel %vm59_vm7, %v151_v27, %v153_v26 }
  0xdb   :  { %331 = vmatprep.subr.mxu1 %v155_v28 }
  0xdd   :  { %v149_v29 = vpop.permute.xlu1 %148  ;;  %v54_v30 = vpop.permute.xlu0 %53 }
  0xde   :  { %v60_v31 = vsel %vm59_vm7, %v54_v30, %v56_v24  ;;  %v154_v32 = vsel %vm59_vm7, %v149_v29, %v151_v27 }
  0xdf   :  { %261 = vmatpush1.msra.mxu0 %v60_v31  ;;  %332 = vmatpush1.msra.mxu1 %v154_v32 }
  0xe0   :  { %262 = vmatprep.subr.mxu0 %v773_v1  ;;  %333 = vmatprep.subr.mxu1 %v771_v0 }
  0xe1   :  { %263 = vmatpush1.msra.mxu0 %v779_v5  ;;  %334 = vmatpush1.msra.mxu1 %v777_v4 }
  0xe2   :  { %628 = vmatmul.mubr.msk.f32.vlgmr.msra.gmra.mxu0 %vm228_vm8, %v41_v33  ;;  %629 = vmatmul.mubr.msk.f32.vlgmr.msra.gmra.mxu1 %vm228_vm8, %v41_v33 }
  0xe3   :  { %488 = vmatprep.mubr.f32.mxu0 %v721_v6  ;;  %559 = vmatprep.mubr.f32.mxu1 %v721_v6 }
  0xea   :  { %v377_v34 = vpop.permute.xlu0 %376  ;;  %v386_v37 = vpop.permute.xlu1 %385 }
  0xee   :  { %v569_v9 = vpop.permute.xlu1 %568  ;;  %v578_v13 = vpop.permute.xlu0 %577 }
 0x1a2   :  { %v298_v35 = vpop.f32.mrf.mxu0  ;;  %v369_v36 = vpop.f32.mrf.mxu1 }
 0x1a3   :  { %v379_v38 = vmul.f32 %v377_v34, %v298_v35  ;;  %v381_v39 = vmul.f32 %v377_v34, %v369_v36 }
 0x1a4   :  { %v300_v40 = vpop.f32.mrf.mxu0  ;;  %v371_v1 = vpop.f32.mrf.mxu1 }
 0x1a5   :  { %v388_v41 = vadd.f32 %v386_v37, %v379_v38  ;;  %v390_v0 = vadd.f32 %v386_v37, %v381_v39  ;;  %v380_v42 = vmul.f32 %v377_v34, %v300_v40  ;;  %v382_v5 = vmul.f32 %v377_v34, %v371_v1 }
 0x1a7   :  { %v396_v43 = vmul.f32 1.442695, %v388_v41  ;;  %v400_v4 = vmul.f32 1.442695, %v390_v0  ;;  %v389_v44 = vadd.f32 %v386_v37, %v380_v42  ;;  %v391_v45 = vadd.f32 %v386_v37, %v382_v5 }
 0x1a8   :  { %vm392_vm9 = vcmp.gt.f32.partialorder %v388_v41, 0.0  ;;  %vm394_vm10 = vcmp.gt.f32.partialorder %v390_v0, 0.0 }
 0x1a9   :  { %659 = vpow2.f32 %v396_v43  ;;  %v398_v46 = vmul.f32 1.442695, %v389_v44  ;;  %v402_v6 = vmul.f32 1.442695, %v391_v45  ;;  %vm393_vm11 = vcmp.gt.f32.partialorder %v389_v44, 0.0 }
 0x1aa   :  { %661 = vpow2.f32 %v400_v4  ;;  %vm395_vm12 = vcmp.gt.f32.partialorder %v391_v45, 0.0 }
 0x1ab   :  { %663 = vpow2.f32 %v398_v46 }
 0x1ac   :  { %665 = vpow2.f32 %v402_v6 }
 0x1b6   :  { %v660_v47 = vpop.eup %659 }
 0x1b7   :  { %v662_v48 = vpop.eup %661  ;;  %v630_v49 = vadd.f32 -1.0, %v660_v47 }
 0x1b8   :  { %v632_v50 = vadd.f32 -1.0, %v662_v48  ;;  %v664_v51 = vpop.eup %663 }
 0x1b9   :  { %v408_v52 = vmul.f32 1.6732632, %v630_v49  ;;  %v666_v53 = vpop.eup %665  ;;  %v631_v55 = vadd.f32 -1.0, %v664_v51 }
 0x1ba   :  { %v410_v54 = vmul.f32 1.6732632, %v632_v50  ;;  %v633_v56 = vadd.f32 -1.0, %v666_v53 }
 0x1bb   :  { %v409_v57 = vmul.f32 1.6732632, %v631_v55  ;;  %v412_v58 = vsel %vm392_vm9, %v388_v41, %v408_v52 }
 0x1bc   :  { %v411_v59 = vmul.f32 1.6732632, %v633_v56  ;;  %v414_v60 = vsel %vm394_vm10, %v390_v0, %v410_v54  ;;  %v416_v2 = vmul.f32 1.050701, %v412_v58 }
 0x1bd   :  { %v413_v61 = vsel %vm393_vm11, %v389_v44, %v409_v57  ;;  %v418_v8 = vmul.f32 1.050701, %v414_v60 }
 0x1be   :  { %v417_v62 = vmul.f32 1.050701, %v413_v61  ;;  %v415_v63 = vsel %vm395_vm12, %v391_v45, %v411_v59 }
 0x1bf   :  { %v419_v3 = vmul.f32 1.050701, %v415_v63 }
 0x1c0   :  { %454 = vmatprep.subr.mxu0 %v417_v62 }
 0x1c1   :  { %525 = vmatprep.subr.mxu1 %v419_v3  ;;  %455 = vmatpush1.msra.mxu0 %v416_v2 }
 0x1c2   :  { %526 = vmatpush1.msra.mxu1 %v418_v8  ;;  %634 = vmatmul.mubr.msk.f32.vlgmr.msra.gmra.mxu0 %vm420_vm13, %v42_v7 }
 0x1c3   :  { %635 = vmatmul.mubr.msk.f32.vlgmr.msra.gmra.mxu1 %vm420_vm13, %v42_v7 }
 0x282   :  { %v490_v10 = vpop.f32.mrf.mxu0 }
 0x283   :  { %v571_v11 = vmul.f32 %v569_v9, %v490_v10  ;;  %v561_v12 = vpop.f32.mrf.mxu1 }
 0x284   :  { %v573_v14 = vmul.f32 %v569_v9, %v561_v12  ;;  %v492_v15 = vpop.f32.mrf.mxu0 }
 0x285   :  { %v580_v16 = vadd.f32 %v578_v13, %v571_v11  ;;  %v572_v17 = vmul.f32 %v569_v9, %v492_v15  ;;  %v563_v18 = vpop.f32.mrf.mxu1 }
 0x286   :  { %v582_v19 = vadd.f32 %v578_v13, %v573_v14  ;;  %v574_v20 = vmul.f32 %v569_v9, %v563_v18 }
 0x287   :  { %vm584_vm14 = vcmp.ge.f32.partialorder %v580_v16, 0.0  ;;  %v581_v21 = vadd.f32 %v578_v13, %v572_v17 }
 0x288   :  { %vm586_vm15 = vcmp.ge.f32.partialorder %v582_v19, 0.0  ;;  %v583_v22 = vadd.f32 %v578_v13, %v574_v20  ;;  %v588_v24 = vsel %vm584_vm14, 1.0, %v725_v23 }
 0x289   :  { %vm585_vm0 = vcmp.ge.f32.partialorder %v581_v21, 0.0  ;;  %v590_v26 = vsel %vm586_vm15, 1.0, %v725_v23 }
 0x28a   :  { %v589_v25 = vsel %vm585_vm0, 1.0, %v725_v23  ;;  %vm587_vm1 = vcmp.ge.f32.partialorder %v583_v22, 0.0 }
 0x28b   :  { %v638_v27 = vpack.c.bf16 %v589_v25, %v588_v24  ;;  %v591_v28 = vsel %vm587_vm1, 1.0, %v725_v23 }
 0x28c   :  { %v639_v29 = vpack.c.bf16 %v591_v28, %v590_v26 }
 0x28d   :  { %602 = vst [vmem:[#allocation5] sm:$0xff] %v638_v27 }
 0x28e   :  { %610 = vst [vmem:[#allocation5 + $0x8] sm:$0xff] %v639_v29 }
 0x28f   :  { %698 = shalt.err (!%p695_p9)
}
 0x290   :  { %s726_s24 = smov 128   ;;  %s727_s25 = smov 8  }
 0x291   :  { %622 = dma.vmem_to_hbm [thread:$0]  %s617_s6, 256, %s847_s7, [#allocation4], %s726_s24, %s726_s24, %s727_s25  }
 0x292   :  { %709 = dma.done.wait [#allocation4], 256  }
 0x293   :  { %710 = vsyncadd [#allocation4], 4294967040 }
 0x294   :  { %626 = vsyncpa [#allocation3], 1 }
 0x295   :  { %627 = vsyncpa [#allocation4], 1 }

</bundles_post_ra>
